<compile_context>
chip_gen: v5e
topology: v5e:2x2
jax: 0.10.0
libtpu: 0.0.40
codegen_flags: <defaults>
</compile_context>

<pallas_src>
import functools

import jax
import jax.numpy as jnp
import numpy as np
from jax.experimental import pallas as pl
from jax.experimental.pallas import tpu as pltpu

# ------------------------- static problem sizes ----------------------------
B = 2        # batch
C_IN = 4     # input channels
L = 16       # sequence length
N_TAPS = 40  # fused branch-conv window (39 real taps + 1 zero tap)
EPS = 1e-5


# ------------------------------ Pallas kernel ------------------------------
def inception_kernel(xim_ref, xw_ref, wg_ref, wpt_ref, wf_ref, consts_ref,
                     out_ref, *, batch, seq, c_in):
    """Single invocation, whole batch.

    xim_ref   : (B*L, 40*C)  im2col of zero-padded input (tap-major, ch-minor)
    xw_ref    : (3*B*L, C)   [left | center | right] edge-clamped maxpool rows
    wg_ref    : (40*C, 128)  bottleneck folded through conv1/2/3, BN1 scale
                             folded (lanes 0:96 real, 96:128 zero)
    wpt_ref   : (2*C, 128)   rows 0:C  = maxpool-branch 1x1 (lanes 96:128,
                             BN1 scale folded); rows C:2C = shortcut 1x1
                             (BN2 scale folded)
    wf_ref    : (256, 128)   final Linear with BN3 scale folded
    consts_ref: (3, 128)     rows: BN1 shift, BN2 shift, folded linear bias
    out_ref   : (B, 128)
    """
    n = batch * seq
    t1 = consts_ref[0:1, :]
    t2 = consts_ref[1:2, :]
    bf = consts_ref[2:3, :]

    # Inception branch convs (bottleneck + conv1/2/3, BN1 scale folded):
    # one lane-dense MXU matmul on the im2col slab.
    acc = jnp.dot(xim_ref[...], wg_ref[...],
                  preferred_element_type=jnp.float32)            # (B*L, 128)

    # MaxPool1d(k=3, s=1, p=1) branch: max over edge-clamped neighbor rows
    # (clamping == PyTorch's implicit -inf padding), then 1x1 conv that only
    # feeds lanes 96:128 of the same accumulator.
    xw = xw_ref[...]                                             # (3*B*L, C)
    left, ctr, right = xw[0:n], xw[n:2 * n], xw[2 * n:3 * n]
    mpx = jnp.maximum(jnp.maximum(left, ctr), right)             # (B*L, C)
    acc = acc + jnp.dot(mpx, wpt_ref[0:c_in, :],
                        preferred_element_type=jnp.float32)

    # Shortcut 1x1 conv with BN2 folded (added after BN1 + ReLU below).
    sc = jnp.dot(ctr, wpt_ref[c_in:2 * c_in, :],
                 preferred_element_type=jnp.float32) + t2

    # BN1 (shift only; scale folded) + ReLU, then shortcut add + ReLU.
    z = jnp.maximum(acc + t1, 0.0)                               # (B*L, 128)
    z = jnp.maximum(z + sc, 0.0)

    # Adaptive max / avg pool (output_size=1) per batch element.
    inv_l = 1.0 / seq
    mp_rows, ap_rows = [], []
    for b in range(batch):                                       # static B=2
        zb = z[b * seq:(b + 1) * seq]
        mp_rows.append(jnp.max(zb, axis=0, keepdims=True))
        ap_rows.append(jnp.sum(zb, axis=0, keepdims=True) * inv_l)
    feat = jnp.concatenate(
        [jnp.concatenate(mp_rows, axis=0),
         jnp.concatenate(ap_rows, axis=0)], axis=1)              # (B, 256)

    # cat([mp, ap]) -> BN3 -> Dropout (identity, eval) -> Linear,
    # all folded into wf / bf.
    out_ref[...] = jnp.dot(feat, wf_ref[...],
                           preferred_element_type=jnp.float32) + bf


# ------------------------------ parameters ---------------------------------
def _bn_init(key, n):
    k1, k2, k3, k4 = jax.random.split(key, 4)
    gamma = 1.0 + 0.1 * jax.random.normal(k1, (n,), jnp.float32)
    beta = 0.1 * jax.random.normal(k2, (n,), jnp.float32)
    mean = 0.1 * jax.random.normal(k3, (n,), jnp.float32)
    var = jax.random.uniform(k4, (n,), jnp.float32, 0.5, 1.5)
    return gamma, beta, mean, var


def _bn_fold(gamma, beta, mean, var):
    scale = gamma / jnp.sqrt(var + EPS)
    shift = beta - mean * scale
    return scale, shift


def init_params(key, c_in):
    ks = jax.random.split(key, 11)
    p = {}
    # PyTorch conv weight layout: (out_ch, in_ch, k)
    p['Wb'] = 0.3 * jax.random.normal(ks[0], (32, c_in, 1), jnp.float32)
    p['W1'] = 0.05 * jax.random.normal(ks[1], (32, 32, 39), jnp.float32)
    p['W2'] = 0.08 * jax.random.normal(ks[2], (32, 32, 19), jnp.float32)
    p['W3'] = 0.10 * jax.random.normal(ks[3], (32, 32, 9), jnp.float32)
    p['Wcb'] = 0.3 * jax.random.normal(ks[4], (32, c_in, 1), jnp.float32)
    p['Wsc'] = 0.3 * jax.random.normal(ks[5], (128, c_in, 1), jnp.float32)
    # PyTorch Linear weight layout: (out_features, in_features)
    p['Wln'] = 0.1 * jax.random.normal(ks[6], (128, 256), jnp.float32)
    p['bln'] = 0.1 * jax.random.normal(ks[7], (128,), jnp.float32)
    p['bn1'] = _bn_init(ks[8], 128)
    p['bn2'] = _bn_init(ks[9], 128)
    p['bn3'] = _bn_init(ks[10], 256)
    return p


# ------------------------------ Pallas wrapper ------------------------------
@jax.jit
def pallas_forward(x_ncl, p):
    b, c, seq = x_ncl.shape

    x_blc = jnp.transpose(x_ncl, (0, 2, 1)).astype(jnp.float32)     # (B, L, C)

    # ---------------- weight folding (inference BN, running stats) ----------
    s1, t1 = _bn_fold(*p['bn1'])                                    # (128,)
    s2, t2 = _bn_fold(*p['bn2'])                                    # (128,)
    s3, t3 = _bn_fold(*p['bn3'])                                    # (256,)

    # Fold the 1x1 bottleneck (bias=False) through the three branch convs:
    #   fused[k, c, o] = sum_m W_branch[o, m, k] * Wb[m, c]
    wb = p['Wb'][:, :, 0]                                           # (32, C)
    w1 = jnp.einsum('omk,mc->kco', p['W1'], wb)                     # (39, C, 32)
    w2 = jnp.einsum('omk,mc->kco', p['W2'], wb)                     # (19, C, 32)
    w3 = jnp.einsum('omk,mc->kco', p['W3'], wb)                     # (9, C, 32)
    # 40-tap fused weight (last tap zero), output lanes:
    #   0:32 conv1 (k=39, pad=19 -> taps 0..38), 32:64 conv2 (taps 10..28),
    #   64:96 conv3 (taps 15..23), 96:128 zero (maxpool branch added later).
    w_all = jnp.zeros((N_TAPS, c, 128), jnp.float32)
    w_all = w_all.at[0:39, :, 0:32].set(w1)
    w_all = w_all.at[10:29, :, 32:64].set(w2)
    w_all = w_all.at[15:24, :, 64:96].set(w3)
    w_all = w_all * s1[None, None, :]                               # fold BN1 scale
    wg = w_all.reshape(N_TAPS * c, 128)

    # Maxpool-branch 1x1 (lanes 96:128, BN1 folded) + shortcut 1x1 (BN2 folded).
    wcb = jnp.zeros((c, 128), jnp.float32).at[:, 96:128].set(
        jnp.transpose(p['Wcb'][:, :, 0], (1, 0))) * s1[None, :]
    wsc = jnp.transpose(p['Wsc'][:, :, 0], (1, 0)) * s2[None, :]
    wpt = jnp.concatenate([wcb, wsc], axis=0)                       # (2C, 128)

    # Final Linear with BN3 folded.  Dropout(p=0.25) is identity in eval mode.
    wln_t = jnp.transpose(p['Wln'], (1, 0))                         # (256, 128)
    wf = wln_t * s3[:, None]
    bf = t3 @ wln_t + p['bln']                                      # (128,)
    consts = jnp.stack([t1, t2, bf], axis=0)                        # (3, 128)

    # ---------------- layout prep (pure data movement, no arithmetic) -------
    # im2col of zero-padded input: row l of element b holds taps 0..39 at
    # padded positions l..l+39 (pad 19 left / 21 right), tap-major, ch-minor.
    xp = jnp.pad(x_blc, ((0, 0), (19, N_TAPS - 19), (0, 0)))        # (B, L+40, C)
    idx = jnp.arange(seq)[:, None] + jnp.arange(N_TAPS)[None, :]    # (L, 40)
    xim = xp[:, idx, :].reshape(b * seq, N_TAPS * c)                # (B*L, 40C)

    # Edge-clamped neighbor rows for MaxPool1d(k=3, s=1, p=1).
    left = jnp.concatenate([x_blc[:, :1, :], x_blc[:, :-1, :]], axis=1)
    right = jnp.concatenate([x_blc[:, 1:, :], x_blc[:, -1:, :]], axis=1)
    xw = jnp.concatenate([left, x_blc, right], axis=0).reshape(3 * b * seq, c)

    kernel = functools.partial(inception_kernel, batch=b, seq=seq, c_in=c)

    out = pl.pallas_call(
        kernel,
        out_shape=jax.ShapeDtypeStruct((b, 128), jnp.float32),
        grid=(1,),                                   # whole batch, one step
        in_specs=[
            pl.BlockSpec((b * seq, N_TAPS * c), lambda i: (0, 0)),   # xim
            pl.BlockSpec((3 * b * seq, c), lambda i: (0, 0)),        # xw
            pl.BlockSpec((N_TAPS * c, 128), lambda i: (0, 0)),       # wg
            pl.BlockSpec((2 * c, 128), lambda i: (0, 0)),            # wpt
            pl.BlockSpec((256, 128), lambda i: (0, 0)),              # wf
            pl.BlockSpec((3, 128), lambda i: (0, 0)),                # consts
        ],
        out_specs=pl.BlockSpec((b, 128), lambda i: (0, 0)),
        compiler_params=pltpu.CompilerParams(
            dimension_semantics=("arbitrary",)),
    )(xim, xw, wg, wpt, wf, consts)
    return out


# ------------------------- pure-JAX reference (for checking) ---------------
def _conv1d(x, w, padding):
    return jax.lax.conv_general_dilated(
        x, w, window_strides=(1,), padding=[(padding, padding)],
        dimension_numbers=('NCH', 'OIH', 'NCH'))


def reference_forward(x, p):
    def bn3d(y, gamma, beta, mean, var):
        return ((y - mean[None, :, None]) / jnp.sqrt(var[None, :, None] + EPS)
                * gamma[None, :, None] + beta[None, :, None])

    bottled = _conv1d(x, p['Wb'], 0)
    c1 = _conv1d(bottled, p['W1'], 19)
    c2 = _conv1d(bottled, p['W2'], 9)
    c3 = _conv1d(bottled, p['W3'], 4)
    mpx = jax.lax.reduce_window(x, -jnp.inf, jax.lax.max,
                                (1, 1, 3), (1, 1, 1),
                                [(0, 0), (0, 0), (1, 1)])
    cb = _conv1d(mpx, p['Wcb'], 0)
    y = jnp.concatenate([c1, c2, c3, cb], axis=1)
    y = jax.nn.relu(bn3d(y, *p['bn1']))
    sc = bn3d(_conv1d(x, p['Wsc'], 0), *p['bn2'])
    z = jax.nn.relu(y + sc)
    mp = jnp.max(z, axis=2)
    ap = jnp.mean(z, axis=2)
    feat = jnp.concatenate([mp, ap], axis=1)               # (B, 256)
    g, bta, mn, vr = p['bn3']
    feat = (feat - mn[None, :]) / jnp.sqrt(vr[None, :] + EPS) * g[None, :] + bta[None, :]
    # dropout: identity in eval mode
    return feat @ p['Wln'].T + p['bln'][None, :]


# ----------------------------------- main -----------------------------------
if __name__ == "__main__":
    key = jax.random.PRNGKey(0)
    kx, kp = jax.random.split(key)
    x = jax.random.normal(kx, (B, C_IN, L), jnp.float32)    # PyTorch NCL layout
    params = init_params(kp, C_IN)

    out = pallas_forward(x, params)
    out = jax.block_until_ready(out)

    ref = jax.block_until_ready(reference_forward(x, params))
    np.testing.assert_allclose(np.asarray(out), np.asarray(ref),
                               rtol=2e-3, atol=2e-3)
    print("KERNEL_OK")
</pallas_src>

<mosaic_0001>
module attributes {stable_mosaic.version = 11 : i64} {
  func.func @inception_kernel(%arg0: i32, %arg1: memref<32x160xf32, #tpu.memory_space<vmem>>, %arg2: memref<96x4xf32, #tpu.memory_space<vmem>>, %arg3: memref<160x128xf32, #tpu.memory_space<vmem>>, %arg4: memref<8x128xf32, #tpu.memory_space<vmem>>, %arg5: memref<256x128xf32, #tpu.memory_space<vmem>>, %arg6: memref<3x128xf32, #tpu.memory_space<vmem>>, %arg7: memref<2x128xf32, #tpu.memory_space<vmem>>) attributes {dimension_semantics = [#tpu.dimension_semantics<arbitrary>], iteration_bounds = array<i64: 1>, scalar_prefetch = 0 : i64, scratch_operands = 0 : i64, tpu.core_type = #tpu.core_type<tc>, window_params = [{pipeline_mode = #tpu.pipeline_mode<synchronous>, transform_indices = @transform_0, window_bounds = array<i64: 32, 160>}, {pipeline_mode = #tpu.pipeline_mode<synchronous>, transform_indices = @transform_1, window_bounds = array<i64: 96, 4>}, {pipeline_mode = #tpu.pipeline_mode<synchronous>, transform_indices = @transform_2, window_bounds = array<i64: 160, 128>}, {pipeline_mode = #tpu.pipeline_mode<synchronous>, transform_indices = @transform_3, window_bounds = array<i64: 8, 128>}, {pipeline_mode = #tpu.pipeline_mode<synchronous>, transform_indices = @transform_4, window_bounds = array<i64: 256, 128>}, {pipeline_mode = #tpu.pipeline_mode<synchronous>, transform_indices = @transform_5, window_bounds = array<i64: 3, 128>}, {pipeline_mode = #tpu.pipeline_mode<synchronous>, transform_indices = @transform_6, window_bounds = array<i64: 2, 128>}]} {
    %c0 = arith.constant 0 : index
    %c0_0 = arith.constant 0 : index
    %0 = vector.load %arg6[%c0, %c0_0] : memref<3x128xf32, #tpu.memory_space<vmem>>, vector<1x128xf32>
    %c1 = arith.constant 1 : index
    %c0_1 = arith.constant 0 : index
    %1 = vector.load %arg6[%c1, %c0_1] : memref<3x128xf32, #tpu.memory_space<vmem>>, vector<1x128xf32>
    %c2 = arith.constant 2 : index
    %c0_2 = arith.constant 0 : index
    %2 = vector.load %arg6[%c2, %c0_2] : memref<3x128xf32, #tpu.memory_space<vmem>>, vector<1x128xf32>
    %c0_3 = arith.constant 0 : index
    %c0_4 = arith.constant 0 : index
    %3 = vector.load %arg1[%c0_3, %c0_4] : memref<32x160xf32, #tpu.memory_space<vmem>>, vector<32x160xf32>
    %c0_5 = arith.constant 0 : index
    %c0_6 = arith.constant 0 : index
    %4 = vector.load %arg3[%c0_5, %c0_6] : memref<160x128xf32, #tpu.memory_space<vmem>>, vector<160x128xf32>
    %cst = arith.constant dense<0.000000e+00> : vector<32x128xf32>
    %5 = tpu.matmul %3, %4, %cst {dimension_numbers = #tpu.dot_dimension_numbers<[1], [0], [0], [1], [0, 0, 1, 1], [], []>} : vector<32x160xf32>, vector<160x128xf32>, vector<32x128xf32> -> vector<32x128xf32>
    %c0_7 = arith.constant 0 : index
    %c0_8 = arith.constant 0 : index
    %6 = vector.load %arg2[%c0_7, %c0_8] : memref<96x4xf32, #tpu.memory_space<vmem>>, vector<96x4xf32>
    %7 = vector.extract_strided_slice %6 {offsets = [0, 0], sizes = [32, 4], strides = [1, 1]} : vector<96x4xf32> to vector<32x4xf32>
    %8 = vector.extract_strided_slice %6 {offsets = [32, 0], sizes = [32, 4], strides = [1, 1]} : vector<96x4xf32> to vector<32x4xf32>
    %9 = vector.extract_strided_slice %6 {offsets = [64, 0], sizes = [32, 4], strides = [1, 1]} : vector<96x4xf32> to vector<32x4xf32>
    %10 = arith.maximumf %7, %8 : vector<32x4xf32>
    %11 = arith.maximumf %10, %9 : vector<32x4xf32>
    %c0_9 = arith.constant 0 : index
    %c0_10 = arith.constant 0 : index
    %12 = vector.load %arg4[%c0_9, %c0_10] : memref<8x128xf32, #tpu.memory_space<vmem>>, vector<4x128xf32>
    %cst_11 = arith.constant dense<0.000000e+00> : vector<32x128xf32>
    %13 = tpu.matmul %11, %12, %cst_11 {dimension_numbers = #tpu.dot_dimension_numbers<[1], [0], [0], [1], [0, 0, 1, 1], [], []>} : vector<32x4xf32>, vector<4x128xf32>, vector<32x128xf32> -> vector<32x128xf32>
    %14 = arith.addf %5, %13 : vector<32x128xf32>
    %c4 = arith.constant 4 : index
    %c0_12 = arith.constant 0 : index
    %15 = vector.load %arg4[%c4, %c0_12] : memref<8x128xf32, #tpu.memory_space<vmem>>, vector<4x128xf32>
    %cst_13 = arith.constant dense<0.000000e+00> : vector<32x128xf32>
    %16 = tpu.matmul %8, %15, %cst_13 {dimension_numbers = #tpu.dot_dimension_numbers<[1], [0], [0], [1], [0, 0, 1, 1], [], []>} : vector<32x4xf32>, vector<4x128xf32>, vector<32x128xf32> -> vector<32x128xf32>
    %17 = vector.broadcast %1 : vector<1x128xf32> to vector<32x128xf32>
    %18 = arith.addf %16, %17 : vector<32x128xf32>
    %19 = vector.broadcast %0 : vector<1x128xf32> to vector<32x128xf32>
    %20 = arith.addf %14, %19 : vector<32x128xf32>
    %cst_14 = arith.constant 0.000000e+00 : f32
    %21 = vector.broadcast %cst_14 : f32 to vector<32x128xf32>
    %22 = arith.maximumf %20, %21 : vector<32x128xf32>
    %23 = arith.addf %22, %18 : vector<32x128xf32>
    %cst_15 = arith.constant 0.000000e+00 : f32
    %24 = vector.broadcast %cst_15 : f32 to vector<32x128xf32>
    %25 = arith.maximumf %23, %24 : vector<32x128xf32>
    %26 = vector.extract_strided_slice %25 {offsets = [0, 0], sizes = [16, 128], strides = [1, 1]} : vector<32x128xf32> to vector<16x128xf32>
    %cst_16 = arith.constant dense<0xFF800000> : vector<128xf32>
    %27 = vector.multi_reduction <maximumf>, %26, %cst_16 [0] : vector<16x128xf32> to vector<128xf32>
    %28 = vector.shape_cast %27 : vector<128xf32> to vector<1x128xf32>
    %cst_17 = arith.constant dense<0.000000e+00> : vector<128xf32>
    %29 = vector.multi_reduction <add>, %26, %cst_17 [0] : vector<16x128xf32> to vector<128xf32>
    %30 = vector.shape_cast %29 : vector<128xf32> to vector<1x128xf32>
    %cst_18 = arith.constant 6.250000e-02 : f32
    %31 = vector.broadcast %cst_18 : f32 to vector<1x128xf32>
    %32 = arith.mulf %30, %31 : vector<1x128xf32>
    %33 = vector.extract_strided_slice %25 {offsets = [16, 0], sizes = [16, 128], strides = [1, 1]} : vector<32x128xf32> to vector<16x128xf32>
    %cst_19 = arith.constant dense<0xFF800000> : vector<128xf32>
    %34 = vector.multi_reduction <maximumf>, %33, %cst_19 [0] : vector<16x128xf32> to vector<128xf32>
    %35 = vector.shape_cast %34 : vector<128xf32> to vector<1x128xf32>
    %cst_20 = arith.constant dense<0.000000e+00> : vector<128xf32>
    %36 = vector.multi_reduction <add>, %33, %cst_20 [0] : vector<16x128xf32> to vector<128xf32>
    %37 = vector.shape_cast %36 : vector<128xf32> to vector<1x128xf32>
    %cst_21 = arith.constant 6.250000e-02 : f32
    %38 = vector.broadcast %cst_21 : f32 to vector<1x128xf32>
    %39 = arith.mulf %37, %38 : vector<1x128xf32>
    %40 = tpu.concatenate %28, %35 in 0 : vector<1x128xf32>, vector<1x128xf32> -> vector<2x128xf32>
    %41 = tpu.concatenate %32, %39 in 0 : vector<1x128xf32>, vector<1x128xf32> -> vector<2x128xf32>
    %42 = tpu.concatenate %40, %41 in 1 : vector<2x128xf32>, vector<2x128xf32> -> vector<2x256xf32>
    %c0_22 = arith.constant 0 : index
    %c0_23 = arith.constant 0 : index
    %43 = vector.load %arg5[%c0_22, %c0_23] : memref<256x128xf32, #tpu.memory_space<vmem>>, vector<256x128xf32>
    %cst_24 = arith.constant dense<0.000000e+00> : vector<2x128xf32>
    %44 = tpu.matmul %42, %43, %cst_24 {dimension_numbers = #tpu.dot_dimension_numbers<[1], [0], [0], [1], [0, 0, 1, 1], [], []>} : vector<2x256xf32>, vector<256x128xf32>, vector<2x128xf32> -> vector<2x128xf32>
    %45 = vector.broadcast %2 : vector<1x128xf32> to vector<2x128xf32>
    %46 = arith.addf %44, %45 : vector<2x128xf32>
    %c0_25 = arith.constant 0 : index
    %c0_26 = arith.constant 0 : index
    %47 = vector.load %arg7[%c0_25, %c0_26] : memref<2x128xf32, #tpu.memory_space<vmem>>, vector<2x128xf32>
    tpu.vector_store %arg7[%c0_25, %c0_26], %46 {strides = array<i32>} : memref<2x128xf32, #tpu.memory_space<vmem>>, vector<2x128xf32>,
    return
  }
  func.func @transform_0(%arg0: i32) -> (i32, i32) {
    %c0_i32 = arith.constant 0 : i32
    %c0_i32_0 = arith.constant 0 : i32
    %c0_i32_1 = arith.constant 0 : i32
    return %c0_i32, %c0_i32_0 : i32, i32
  }
  func.func @transform_1(%arg0: i32) -> (i32, i32) {
    %c0_i32 = arith.constant 0 : i32
    %c0_i32_0 = arith.constant 0 : i32
    %c0_i32_1 = arith.constant 0 : i32
    return %c0_i32, %c0_i32_0 : i32, i32
  }
  func.func @transform_2(%arg0: i32) -> (i32, i32) {
    %c0_i32 = arith.constant 0 : i32
    %c0_i32_0 = arith.constant 0 : i32
    %c0_i32_1 = arith.constant 0 : i32
    return %c0_i32, %c0_i32_0 : i32, i32
  }
  func.func @transform_3(%arg0: i32) -> (i32, i32) {
    %c0_i32 = arith.constant 0 : i32
    %c0_i32_0 = arith.constant 0 : i32
    %c0_i32_1 = arith.constant 0 : i32
    return %c0_i32, %c0_i32_0 : i32, i32
  }
  func.func @transform_4(%arg0: i32) -> (i32, i32) {
    %c0_i32 = arith.constant 0 : i32
    %c0_i32_0 = arith.constant 0 : i32
    %c0_i32_1 = arith.constant 0 : i32
    return %c0_i32, %c0_i32_0 : i32, i32
  }
  func.func @transform_5(%arg0: i32) -> (i32, i32) {
    %c0_i32 = arith.constant 0 : i32
    %c0_i32_0 = arith.constant 0 : i32
    %c0_i32_1 = arith.constant 0 : i32
    return %c0_i32, %c0_i32_0 : i32, i32
  }
  func.func @transform_6(%arg0: i32) -> (i32, i32) {
    %c0_i32 = arith.constant 0 : i32
    %c0_i32_0 = arith.constant 0 : i32
    %c0_i32_1 = arith.constant 0 : i32
    return %c0_i32, %c0_i32_0 : i32, i32
  }
}

</mosaic_0001>

<bundles_post_ra>
// kernel: pallas_forward.1
= control target key start
LH: loop header
LB: loop body
LE: loop exit
PB: predicated region body
PF: predicated region fallthrough
CT: control target
= control target key end

     0   :  { %vm89_vm0 = vcmask 1043456   ;;  %vm76_vm1 = vcmask 31744   ;;  %vm122_vm2 = vcmask 261120   ;;  %s713_s0 = inlined_call_operand.vmem [shape: f32[32,160], index: 0, kind: input, shape index: {}]   ;;  %s714_s1 = inlined_call_operand.vmem [shape: f32[96,4], index: 1, kind: input, shape index: {}]   ;;  %s715_s2 = inlined_call_operand.vmem [shape: f32[160,128], index: 2, kind: input, shape index: {}]   ;;  %s716_s3 = inlined_call_operand.vmem [shape: f32[8,128], index: 3, kind: input, shape index: {}]   ;;  %s717_s4 = inlined_call_operand.vmem [shape: f32[256,128], index: 4, kind: input, shape index: {}]   ;;  %s718_s5 = inlined_call_operand.vmem [shape: f32[3,128], index: 5, kind: input, shape index: {}]   ;;  %s719_s6 = inlined_call_operand.hbm [shape: f32[2,128], index: 6, kind: output, shape index: {}]  }
   0x1   :  { %v50_v0 = vld [vmem:[%s715_s2 + $0x78] sm:$0xff]  ;;  %v49_v1 = vld [vmem:[%s715_s2 + $0x70] sm:$0xff]  ;;  %v48_v2 = vld [vmem:[%s715_s2 + $0x68] sm:$0xff] }
   0x2   :  { %135 = vmatpush.msra.mxu1 %v50_v0  ;;  %v54_v3 = vld [vmem:[%s715_s2 + $0x98] sm:$0xff]  ;;  %v47_v4 = vld [vmem:[%s715_s2 + $0x60] sm:$0xff]  ;;  %v53_v5 = vld [vmem:[%s715_s2 + $0x90] sm:$0xff] }
   0x3   :  { %176 = vmatpush.msra.mxu2 %v54_v3  ;;  %v52_v6 = vld [vmem:[%s715_s2 + $0x88] sm:$0xff]  ;;  %v46_v7 = vld [vmem:[%s715_s2 + $0x58] sm:$0xff]  ;;  %v45_v8 = vld [vmem:[%s715_s2 + $0x50] sm:$0xff] }
   0x4   :  { %136 = vmatpush.msra.mxu1 %v49_v1  ;;  %v75_v9 = vld [vmem:[%s716_s3] sm:$0xf]  ;;  %v193_v11 = vld [vmem:[%s716_s3 + $0x4] sm:$0xf]  ;;  %v28_v13 = vld [vmem:[%s713_s0 + $0x8] sm:$0xff] }
   0x5   :  { %177 = vmatpush.msra.mxu2 %v53_v5  ;;  %v51_v10 = vld [vmem:[%s715_s2 + $0x80] sm:$0xff]  ;;  %379 = vmatpush.msk.msra.mxu0 %vm89_vm0, %v75_v9  ;;  %v44_v17 = vld [vmem:[%s715_s2 + $0x48] sm:$0xff] }
   0x6   :  { %137 = vmatpush.msra.mxu1 %v48_v2  ;;  %v55_v12 = vld [vmem:[%s714_s1] sm:$0xff]  ;;  %388 = vmatpush.msk.msra.mxu3 %vm89_vm0, %v193_v11  ;;  %v56_v18 = vld [vmem:[%s714_s1 + $0x8] sm:$0xff] }
   0x7   :  { %178 = vmatpush.msra.mxu2 %v52_v6  ;;  %v59_v14 = vld [vmem:[%s714_s1 + $0x20] sm:$0xff]  ;;  %v60_v19 = vld [vmem:[%s714_s1 + $0x28] sm:$0xff] }
   0x8   :  { %138 = vmatpush.msra.mxu1 %v47_v4  ;;  %v63_v15 = vld [vmem:[%s714_s1 + $0x40] sm:$0xff]  ;;  %v67_v16 = vmax.f32 %v55_v12, %v59_v14  ;;  %389 = vmatmul.msk.f32.vlgmr.msra.gmra.mxu3 %vm76_vm1, %v59_v14  ;;  %v68_v22 = vmax.f32 %v56_v18, %v60_v19 }
   0x9   :  { %179 = vmatpush.msra.mxu2 %v51_v10  ;;  %v43_v21 = vld [vmem:[%s715_s2 + $0x40] sm:$0xff] }
   0xa   :  { %139 = vmatpush.msra.mxu1 %v46_v7  ;;  %384 = vmatmul.msk.f32.vlgmr.msra.gmra.mxu2 %vm122_vm2, %v28_v13  ;;  %v71_v20 = vmax.f32 %v67_v16, %v63_v15 }
   0xc   :  { %140 = vmatpush.msra.mxu1 %v45_v8  ;;  %380 = vmatmul.msk.f32.vlgmr.msra.gmra.mxu0 %vm76_vm1, %v71_v20 }
   0xe   :  { %141 = vmatpush.msra.mxu1 %v44_v17 }
   0xf   :  { %11 = vsyncpa [#allocation3], 0  ;;  %v42_v23 = vld [vmem:[%s715_s2 + $0x38] sm:$0xff]  ;;  %v64_v24 = vld [vmem:[%s714_s1 + $0x48] sm:$0xff]  ;;  %vm286_vm3 = vcmask 1040384   ;;  %s423_s16 = smov [#allocation2]  }
  0x10   :  { %142 = vmatpush.msra.mxu1 %v43_v21  ;;  %v41_v25 = vld [vmem:[%s715_s2 + $0x30] sm:$0xff]  ;;  %v30_v26 = vld [vmem:[%s713_s0 + $0x18] sm:$0xff]  ;;  %v72_v27 = vmax.f32 %v68_v22, %v64_v24  ;;  %390 = vmatmul.msk.f32.gmra.mxu3 %vm76_vm1, %v60_v19  ;;  %v40_v28 = vld [vmem:[%s715_s2 + $0x28] sm:$0xff]  ;;  %s368_s17 = sshll.u32 %s423_s16, 4  ;;  %s370_s20 = sshll.u32 %s719_s6, 4  ;;  %s369_s17 = int_to_ptr.vmem [resolvable:$true] %s368_s17  ;;  %s371_s20 = int_to_ptr.hbm [resolvable:$true] %s370_s20 }
  0x11   :  { %v57_v29 = vld [vmem:[%s714_s1 + $0x10] sm:$0xff]  ;;  %v39_v31 = vld [vmem:[%s715_s2 + $0x20] sm:$0xff]  ;;  %v38_v33 = vld [vmem:[%s715_s2 + $0x18] sm:$0xff] }
  0x12   :  { %143 = vmatpush.msra.mxu1 %v42_v23  ;;  %v61_v30 = vld [vmem:[%s714_s1 + $0x30] sm:$0xff]  ;;  %385 = vmatmul.msk.f32.gmra.mxu2 %vm122_vm2, %v30_v26  ;;  %v32_v36 = vld [vmem:[%s713_s0 + $0x28] sm:$0xff]  ;;  %v58_v39 = vld [vmem:[%s714_s1 + $0x18] sm:$0xff] }
  0x13   :  { %v69_v32 = vmax.f32 %v57_v29, %v61_v30  ;;  %v65_v34 = vld [vmem:[%s714_s1 + $0x50] sm:$0xff]  ;;  %v36_v38 = vld [vmem:[%s715_s2 + $0x8] sm:$0xff]  ;;  %v62_v40 = vld [vmem:[%s714_s1 + $0x38] sm:$0xff] }
  0x14   :  { %144 = vmatpush.msra.mxu1 %v41_v25  ;;  %381 = vmatmul.msk.f32.gmra.mxu0 %vm76_vm1, %v72_v27  ;;  %v37_v35 = vld [vmem:[%s715_s2 + $0x10] sm:$0xff]  ;;  %v35_v41 = vld [vmem:[%s715_s2] sm:$0xff]  ;;  %v70_v43 = vmax.f32 %v58_v39, %v62_v40  ;;  %v66_v44 = vld [vmem:[%s714_s1 + $0x58] sm:$0xff] }
  0x15   :  { %v73_v37 = vmax.f32 %v69_v32, %v65_v34  ;;  %v27_v42 = vld [vmem:[%s713_s0] sm:$0xff]  ;;  %v34_v45 = vld [vmem:[%s713_s0 + $0x38] sm:$0xff]  ;;  %v29_v47 = vld [vmem:[%s713_s0 + $0x10] sm:$0xff] }
  0x16   :  { %145 = vmatpush.msra.mxu1 %v40_v28  ;;  %v74_v46 = vmax.f32 %v70_v43, %v66_v44  ;;  %v31_v48 = vld [vmem:[%s713_s0 + $0x20] sm:$0xff]  ;;  %v33_v49 = vld [vmem:[%s713_s0 + $0x30] sm:$0xff]  ;;  %v304_v50 = vld [vmem:[%s717_s4 + $0x78] sm:$0xff] }
  0x17   :  { %322 = vmatpush.msrb.mxu0 %v304_v50  ;;  %v320_v51 = vld [vmem:[%s717_s4 + $0xf8] sm:$0xff]  ;;  %v303_v52 = vld [vmem:[%s717_s4 + $0x70] sm:$0xff]  ;;  %v302_v55 = vld [vmem:[%s717_s4 + $0x68] sm:$0xff] }
  0x18   :  { %146 = vmatpush.msra.mxu1 %v39_v31  ;;  %391 = vmatmul.msk.f32.gmra.mxu3 %vm76_vm1, %v61_v30  ;;  %v319_v54 = vld [vmem:[%s717_s4 + $0xf0] sm:$0xff]  ;;  %v318_v57 = vld [vmem:[%s717_s4 + $0xe8] sm:$0xff]  ;;  %v301_v58 = vld [vmem:[%s717_s4 + $0x60] sm:$0xff] }
  0x19   :  { %342 = vmatpush.msrb.mxu3 %v320_v51  ;;  %323 = vmatpush.msrb.mxu0 %v303_v52  ;;  %v317_v60 = vld [vmem:[%s717_s4 + $0xe0] sm:$0xff]  ;;  %v300_v61 = vld [vmem:[%s717_s4 + $0x58] sm:$0xff]  ;;  %v299_v63 = vld [vmem:[%s717_s4 + $0x50] sm:$0xff] }
  0x1a   :  { %147 = vmatpush.msra.mxu1 %v38_v33  ;;  %386 = vmatmul.msk.f32.gmra.mxu2 %vm122_vm2, %v32_v36  ;;  %v316_v62 = vld [vmem:[%s717_s4 + $0xd8] sm:$0xff]  ;;  %v315_v1 = vld [vmem:[%s717_s4 + $0xd0] sm:$0xff]  ;;  %v298_v2 = vld [vmem:[%s717_s4 + $0x48] sm:$0xff] }
  0x1b   :  { %343 = vmatpush.msrb.mxu3 %v319_v54  ;;  %324 = vmatpush.msrb.mxu0 %v302_v55  ;;  %v314_v5 = vld [vmem:[%s717_s4 + $0xc8] sm:$0xff]  ;;  %v297_v6 = vld [vmem:[%s717_s4 + $0x40] sm:$0xff]  ;;  %v296_v9 = vld [vmem:[%s717_s4 + $0x38] sm:$0xff] }
  0x1c   :  { %148 = vmatpush.msra.mxu1 %v37_v35  ;;  %382 = vmatmul.msk.f32.gmra.mxu0 %vm76_vm1, %v73_v37  ;;  %v313_v8 = vld [vmem:[%s717_s4 + $0xc0] sm:$0xff]  ;;  %v312_v13 = vld [vmem:[%s717_s4 + $0xb8] sm:$0xff]  ;;  %v295_v14 = vld [vmem:[%s717_s4 + $0x30] sm:$0xff] }
  0x1d   :  { %344 = vmatpush.msrb.mxu3 %v318_v57  ;;  %325 = vmatpush.msrb.mxu0 %v301_v58  ;;  %v653_v11 = vld [vmem:[%s718_s5] ss:$0 sm:$0xff]  ;;  %v311_v16 = vld [vmem:[%s717_s4 + $0xb0] sm:$0xff]  ;;  %v294_v17 = vld [vmem:[%s717_s4 + $0x28] sm:$0xff] }
  0x1e   :  { %149 = vmatpush.msra.mxu1 %v36_v38  ;;  %v395_v19 = vld [vmem:[%s718_s5 + $0x1] ss:$0 sm:$0xff]  ;;  %v310_v21 = vld [vmem:[%s717_s4 + $0xa8] sm:$0xff]  ;;  %v292_v25 = vld [vmem:[%s717_s4 + $0x18] sm:$0xff] }
  0x1f   :  { %345 = vmatpush.msrb.mxu3 %v317_v60  ;;  %326 = vmatpush.msrb.mxu0 %v300_v61  ;;  %v293_v22 = vld [vmem:[%s717_s4 + $0x20] sm:$0xff]  ;;  %v308_v27 = vld [vmem:[%s717_s4 + $0x98] sm:$0xff]  ;;  %v291_v28 = vld [vmem:[%s717_s4 + $0x10] sm:$0xff] }
  0x20   :  { %150 = vmatpush.msra.mxu1 %v35_v41  ;;  %392 = vmatmul.msk.f32.gmra.mxu3 %vm76_vm1, %v62_v40  ;;  %v309_v24 = vld [vmem:[%s717_s4 + $0xa0] sm:$0xff]  ;;  %v307_v34 = vld [vmem:[%s717_s4 + $0x90] sm:$0xff]  ;;  %v290_v35 = vld [vmem:[%s717_s4 + $0x8] sm:$0xff] }
  0x21   :  { %151 = vmatmul.f32.vlgmr.msra.gmra.mxu1 %v27_v42  ;;  %346 = vmatpush.msrb.mxu3 %v316_v62  ;;  %v306_v39 = vld [vmem:[%s717_s4 + $0x88] sm:$0xff]  ;;  %v289_v40 = vld [vmem:[%s717_s4] sm:$0xff] }
  0x22   :  { %387 = vmatmul.msk.f32.gmra.mxu2 %vm122_vm2, %v34_v45  ;;  %327 = vmatpush.msrb.mxu0 %v299_v63 }
  0x23   :  { %347 = vmatpush.msrb.mxu3 %v315_v1 }
  0x24   :  { %383 = vmatmul.msk.f32.gmra.mxu0 %vm76_vm1, %v74_v46  ;;  %v305_v46 = vld [vmem:[%s717_s4 + $0x80] sm:$0xff] }
  0x25   :  { %328 = vmatpush.msrb.mxu0 %v298_v2  ;;  %348 = vmatpush.msrb.mxu3 %v314_v5 }
  0x27   :  { %329 = vmatpush.msrb.mxu0 %v297_v6  ;;  %349 = vmatpush.msrb.mxu3 %v313_v8 }
  0x29   :  { %154 = vmatmul.f32.gmra.mxu1 %v29_v47  ;;  %330 = vmatpush.msrb.mxu0 %v296_v9 }
  0x2a   :  { %350 = vmatpush.msrb.mxu3 %v312_v13 }
  0x2b   :  { %331 = vmatpush.msrb.mxu0 %v295_v14 }
  0x2c   :  { %351 = vmatpush.msrb.mxu3 %v311_v16 }
  0x2d   :  { %332 = vmatpush.msrb.mxu0 %v294_v17 }
  0x2e   :  { %352 = vmatpush.msrb.mxu3 %v310_v21 }
  0x2f   :  { %333 = vmatpush.msrb.mxu0 %v293_v22 }
  0x30   :  { %353 = vmatpush.msrb.mxu3 %v309_v24 }
  0x31   :  { %157 = vmatmul.f32.gmra.mxu1 %v31_v48  ;;  %334 = vmatpush.msrb.mxu0 %v292_v25 }
  0x32   :  { %354 = vmatpush.msrb.mxu3 %v308_v27 }
  0x33   :  { %335 = vmatpush.msrb.mxu0 %v291_v28 }
  0x34   :  { %355 = vmatpush.msrb.mxu3 %v307_v34 }
  0x35   :  { %336 = vmatpush.msrb.mxu0 %v290_v35 }
  0x36   :  { %356 = vmatpush.msrb.mxu3 %v306_v39 }
  0x37   :  { %337 = vmatpush.msrb.mxu0 %v289_v40 }
  0x38   :  { %357 = vmatpush.msrb.mxu3 %v305_v46 }
  0x39   :  { %160 = vmatmul.f32.gmra.mxu1 %v33_v49 }
  0x89   :  { %v110_v53 = vpop.f32.mrf.mxu0 }
  0x8b   :  { %v227_v59 = vpop.f32.mrf.mxu3 }
  0x8c   :  { %v228_v30 = vadd.f32 %v395_v19, %v227_v59 }
  0x8d   :  { %v181_v56 = vpop.f32.mrf.mxu2 }
  0x91   :  { %v113_v4 = vpop.f32.mrf.mxu0 }
  0x93   :  { %v230_v12 = vpop.f32.mrf.mxu3 }
  0x94   :  { %v231_v32 = vadd.f32 %v395_v19, %v230_v12 }
  0x95   :  { %v184_v7 = vpop.f32.mrf.mxu2 }
  0x99   :  { %v116_v26 = vpop.f32.mrf.mxu0 }
  0x9b   :  { %v233_v38 = vpop.f32.mrf.mxu3 }
  0x9c   :  { %v234_v58 = vadd.f32 %v395_v19, %v233_v38 }
  0x9d   :  { %v187_v33 = vpop.f32.mrf.mxu2 }
  0x9e   :  { %v152_v0 = vpop.f32.mrf.mxu1 }
  0x9f   :  { %v153_v3 = vadd.f32 %v152_v0, %v110_v53 }
  0xa1   :  { %v182_v10 = vadd.f32 %v181_v56, %v153_v3  ;;  %v119_v48 = vpop.f32.mrf.mxu0 }
  0xa3   :  { %v240_v18 = vadd.f32 %v653_v11, %v182_v10  ;;  %v236_v55 = vpop.f32.mrf.mxu3 }
  0xa4   :  { %v237_v62 = vadd.f32 %v395_v19, %v236_v55 }
  0xa5   :  { %v244_v29 = vmax.f32 %v240_v18, 0.0  ;;  %v190_v52 = vpop.f32.mrf.mxu2 }
  0xa6   :  { %v155_v15 = vpop.f32.mrf.mxu1 }
  0xa7   :  { %v156_v20 = vadd.f32 %v155_v15, %v113_v4  ;;  %v248_v41 = vadd.f32 %v244_v29, %v228_v30 }
  0xa9   :  { %v185_v23 = vadd.f32 %v184_v7, %v156_v20  ;;  %v252_v47 = vmax.f32 %v248_v41, 0.0 }
  0xab   :  { %v241_v31 = vadd.f32 %v653_v11, %v185_v23 }
  0xad   :  { %v245_v36 = vmax.f32 %v241_v31, 0.0 }
  0xae   :  { %v158_v37 = vpop.f32.mrf.mxu1 }
  0xaf   :  { %v249_v42 = vadd.f32 %v245_v36, %v231_v32  ;;  %v159_v43 = vadd.f32 %v158_v37, %v116_v26  ;;  %v396_v32 = vld [vmem:[%s718_s5 + $0x2] ss:$0 sm:$0xff] }
  0xb1   :  { %v253_v44 = vmax.f32 %v249_v42, 0.0  ;;  %v188_v45 = vadd.f32 %v187_v33, %v159_v43 }
  0xb3   :  { %v263_v49 = vadd.f32 %v253_v44, %v252_v47  ;;  %v242_v50 = vadd.f32 %v653_v11, %v188_v45  ;;  %v256_v53 = vmax.f32 %v252_v47, %v253_v44 }
  0xb5   :  { %v264_v56 = vrot.slane %v263_v49, 4  ;;  %v246_v57 = vmax.f32 %v242_v50, 0.0  ;;  %v257_v60 = vrot.slane %v256_v53, 4 }
  0xb6   :  { %v161_v51 = vpop.f32.mrf.mxu1 }
  0xb7   :  { %v162_v54 = vadd.f32 %v161_v51, %v119_v48  ;;  %v265_v63 = vadd.f32 %v264_v56, %v263_v49  ;;  %v250_v0 = vadd.f32 %v246_v57, %v234_v58  ;;  %v258_v2 = vmax.f32 %v256_v53, %v257_v60 }
  0xb9   :  { %v191_v59 = vadd.f32 %v190_v52, %v162_v54  ;;  %v266_v4 = vrot.slane %v265_v63, 2  ;;  %v254_v5 = vmax.f32 %v250_v0, 0.0  ;;  %v259_v7 = vrot.slane %v258_v2, 2 }
  0xbb   :  { %v243_v61 = vadd.f32 %v653_v11, %v191_v59  ;;  %v267_v13 = vadd.f32 %v266_v4, %v265_v63  ;;  %v260_v16 = vmax.f32 %v258_v2, %v259_v7 }
  0xbd   :  { %v247_v1 = vmax.f32 %v243_v61, 0.0  ;;  %v268_v18 = vrot.slane %v267_v13, 1  ;;  %v261_v19 = vrot.slane %v260_v16, 1 }
  0xbf   :  { %v251_v3 = vadd.f32 %v247_v1, %v237_v62  ;;  %v269_v23 = vadd.f32 %v268_v18, %v267_v13  ;;  %v262_v25 = vmax.f32 %v260_v16, %v261_v19 }
  0xc1   :  { %v255_v6 = vmax.f32 %v251_v3, 0.0  ;;  %v270_v29 = vmul.f32 0.0625, %v269_v23 }
  0xc3   :  { %v271_v8 = vmax.f32 %v254_v5, %v255_v6  ;;  %v278_v9 = vadd.f32 %v255_v6, %v254_v5 }
  0xc5   :  { %v272_v10 = vrot.slane %v271_v8, 4  ;;  %v279_v12 = vrot.slane %v278_v9, 4 }
  0xc7   :  { %v273_v14 = vmax.f32 %v271_v8, %v272_v10  ;;  %v280_v15 = vadd.f32 %v279_v12, %v278_v9 }
  0xc9   :  { %v274_v17 = vrot.slane %v273_v14, 2  ;;  %v281_v11 = vrot.slane %v280_v15, 2 }
  0xcb   :  { %v275_v20 = vmax.f32 %v273_v14, %v274_v17  ;;  %v282_v21 = vadd.f32 %v281_v11, %v280_v15 }
  0xcd   :  { %v276_v22 = vrot.slane %v275_v20, 1  ;;  %v283_v24 = vrot.slane %v282_v21, 1 }
  0xcf   :  { %v277_v26 = vmax.f32 %v275_v20, %v276_v22  ;;  %v284_v27 = vadd.f32 %v283_v24, %v282_v21 }
  0xd1   :  { %v287_v28 = vsel %vm286_vm3, %v262_v25, %v277_v26  ;;  %v285_v30 = vmul.f32 0.0625, %v284_v27 }
  0xd2   :  { %338 = vmatmul.f32.vlgmr.msrb.gmra.mxu0 %v287_v28 }
  0xd3   :  { %v288_v31 = vsel %vm286_vm3, %v270_v29, %v285_v30 }
  0xd4   :  { %358 = vmatmul.f32.vlgmr.msrb.gmra.mxu3 %v288_v31 }
 0x14f   :  { %v339_v33 = vpop.f32.mrf.mxu0 }
 0x150   :  { %v340_v34 = vadd.f32 %v396_v32, %v339_v33 }
 0x157   :  { %v359_v35 = vpop.f32.mrf.mxu3 }
 0x158   :  { %v360_v36 = vadd.f32 %v359_v35, %v340_v34 }
 0x15a   :  { %362 = vst [vmem:[#allocation2] sm:$0x3] %v360_v36 }
 0x15b   :  { %373 = dma.vmem_to_hbm [thread:$0]  %s369_s17, 32, %s371_s20, [#allocation3]  }
 0x15c   :  { %421 = dma.done.wait [#allocation3], 32  }
 0x15d   :  { %422 = vsyncadd [#allocation3], 4294967264 }
 0x15e   :  { %378 = vsyncpa [#allocation3], 1 }

</bundles_post_ra>
